<compile_context>
chip_gen: v6e
topology: v6e:2x2x1
jax: 0.10.0
libtpu: 0.0.40
codegen_flags: <defaults>
</compile_context>

<pallas_src>
import functools

import jax
import jax.numpy as jnp
from jax import lax
from jax.experimental import pallas as pl
from jax.experimental.pallas import tpu as pltpu


# --------------------------------------------------------------------------
# Hardware / tiling helpers
# --------------------------------------------------------------------------

def _tpu_generation():
    """Best-effort TPU generation sniff from device_kind; None if unknown."""
    try:
        kind = jax.devices()[0].device_kind.lower()
    except Exception:
        return None
    if "7x" in kind or "v7" in kind:
        return "v7x"
    if "v6" in kind:
        return "v6e"
    if "v5 lite" in kind or "v5lite" in kind or "v5e" in kind:
        return "v5e"
    return None


# gen -> (tq_target, tk_target, h_blk_cap, vmem_limit_bytes, score_budget_bytes)
_GEN_CONFIG = {
    "v5e": (512, 256, 2, 80 * 2**20, 2 * 2**20),
    "v6e": (512, 512, 4, 80 * 2**20, 4 * 2**20),
    "v7x": (256, 512, 4, 48 * 2**20, 4 * 2**20),
    None:  (256, 512, 2, 32 * 2**20, 2 * 2**20),
}


def _sublane_granularity(dtype):
    """Sublane tile multiple for the dtype: f32 -> 8, bf16 -> 16, i8/fp8 -> 32."""
    itemsize = jnp.dtype(dtype).itemsize
    return max(8, 32 // max(1, itemsize))


def _pick_tile(n, target, granularity=8):
    """Largest tile <= target that divides n and is a multiple of granularity."""
    if n <= target:
        return n
    t = (target // granularity) * granularity
    while t >= granularity:
        if n % t == 0:
            return t
        t -= granularity
    # TODO(synk): non-factorable axis length; full-axis fallback (no padding /
    # masking path implemented) -- fine for the small shapes used here.
    return n


def _largest_divisor_leq(n, target):
    t = max(1, min(n, target))
    while t > 1:
        if n % t == 0:
            return t
        t -= 1
    return 1


# --------------------------------------------------------------------------
# Kernel
# --------------------------------------------------------------------------

def _flash_attend_kernel(q_ref, k_ref, v_ref, o_ref,
                         q_sc, m_sc, l_sc, acc_sc, *, scale, exp_dtype):
    """One (head-block, q-tile) x kv-tile step of online-softmax attention.

    q_ref: (h_blk, tq, d)   k_ref/v_ref: (h_blk, tk, d)   o_ref: (h_blk, tq, d)
    q_sc: (h_blk, tq, d) q.dtype   m_sc/l_sc: (h_blk, tq, 1) f32
    acc_sc: (h_blk, tq, d) f32
    """
    kv = pl.program_id(2)

    @pl.when(kv == 0)
    def _():
        # Hoisted: the q block is resident across the kv ("arbitrary") axis,
        # so scale + cast it exactly once per q tile instead of every kv step.
        q_sc[...] = (q_ref[...].astype(jnp.float32) * scale).astype(q_sc.dtype)
        m_sc[...] = jnp.full(m_sc.shape, -jnp.inf, dtype=m_sc.dtype)
        l_sc[...] = jnp.zeros(l_sc.shape, dtype=l_sc.dtype)
        acc_sc[...] = jnp.zeros(acc_sc.shape, dtype=acc_sc.dtype)

    q = q_sc[...]
    k = k_ref[...]
    v = v_ref[...]

    # s = einsum('hqd,hkd->hqk'): contract last dims, batch over heads, no k.T.
    s = lax.dot_general(
        q, k,
        dimension_numbers=(((2,), (2,)), ((0,), (0,))),
        preferred_element_type=jnp.float32,
    )  # (h_blk, tq, tk) f32

    m_prev = m_sc[...]
    m_new = jnp.maximum(m_prev, jnp.max(s, axis=-1, keepdims=True))
    alpha = jnp.exp(m_prev - m_new)                       # f32 rescale of old stats

    # Big exp over (h_blk, tq, tk): optionally bf16 on bf16-capable EUPs
    # (v6e / v7x). Bookkeeping (m, l, alpha) stays f32.
    p = jnp.exp((s - m_new).astype(exp_dtype))

    l_sc[...] = alpha * l_sc[...] + jnp.sum(
        p, axis=-1, keepdims=True, dtype=jnp.float32)

    # pv = einsum('hqk,hkd->hqd'): p in v.dtype for the MXU, f32 accumulation.
    pv = lax.dot_general(
        p.astype(v.dtype), v,
        dimension_numbers=(((2,), (1,)), ((0,), (0,))),
        preferred_element_type=jnp.float32,
    )  # (h_blk, tq, d) f32
    acc_sc[...] = alpha * acc_sc[...] + pv
    m_sc[...] = m_new

    @pl.when(kv == pl.num_programs(2) - 1)
    def _():
        # Exact reciprocal: once per q tile, outside the hot kv loop.
        inv_l = pl.reciprocal(l_sc[...], approx=False)
        o_ref[...] = (acc_sc[...] * inv_l).astype(o_ref.dtype)


# --------------------------------------------------------------------------
# Wrapper
# --------------------------------------------------------------------------

def attend(q, k, v, scale=None, dropout=0.0, *, low_precision_exp=None):
    """JAX/Pallas equivalent of Attend.forward (eval mode, non-flash path).

    q, k, v: (b, h, n, d). Returns (b, h, n_q, d).
    """
    # TODO(synk): attn_dropout (training mode, dropout>0) not implemented; eval-mode identity.
    b, h, n_q, d = q.shape
    n_k = k.shape[-2]
    if scale is None:
        scale = d ** (-0.5)

    bh = b * h
    qf = q.reshape(bh, n_q, d)
    kf = k.reshape(bh, n_k, d)
    vf = v.reshape(bh, n_k, d)

    gen = _tpu_generation()
    tq_target, tk_target, h_cap_gen, vmem_limit, score_budget = _GEN_CONFIG.get(
        gen, _GEN_CONFIG[None])

    gran = _sublane_granularity(q.dtype)
    tq = _pick_tile(n_q, tq_target, gran)
    tk = _pick_tile(n_k, tk_target, gran)

    # Head blocking: amortize per-step overhead for small head_dim, but cap by
    # (a) MXU fill, (b) the size of the f32 s/p intermediates, (c) a per-gen cap.
    h_blk = 1
    if d < 128 and bh > 1:
        mxu_cap = max(1, 128 // d)
        score_cap = max(1, score_budget // max(1, tq * tk * 8))   # s + p, ~8 B/elem
        h_blk = _largest_divisor_leq(bh, min(mxu_cap, score_cap, h_cap_gen))

    # v7x megacore guard: keep at least one "parallel" grid axis >= 2.
    if gen == "v7x" and (bh // h_blk) < 2 and (n_q // tq) < 2:
        if bh >= 2:
            h_blk = _largest_divisor_leq(bh, max(1, bh // 2))
        elif tq > gran:
            tq = _pick_tile(n_q, max(gran, tq // 2), gran)

    grid = (bh // h_blk, n_q // tq, n_k // tk)

    # Precision of the big exp: bf16 only on bf16-capable EUPs with bf16 inputs.
    if low_precision_exp is None:
        low_precision_exp = (q.dtype == jnp.bfloat16) and gen in ("v6e", "v7x")
    exp_dtype = jnp.bfloat16 if low_precision_exp else jnp.float32

    itemsize = jnp.dtype(q.dtype).itemsize
    flops = 4 * bh * n_q * n_k * d               # QK^T + PV matmuls
    transcendentals = bh * n_q * n_k             # exp
    # q + out read/written once; K/V re-streamed once per q tile.
    bytes_accessed = (2 * bh * n_q * d + 2 * bh * n_k * d * (n_q // tq)) * itemsize

    kernel = functools.partial(
        _flash_attend_kernel, scale=float(scale), exp_dtype=exp_dtype)

    out = pl.pallas_call(
        kernel,
        out_shape=jax.ShapeDtypeStruct((bh, n_q, d), q.dtype),
        grid_spec=pltpu.PrefetchScalarGridSpec(
            num_scalar_prefetch=0,
            grid=grid,
            in_specs=[
                pl.BlockSpec((h_blk, tq, d), lambda hb, qi, ki: (hb, qi, 0)),
                pl.BlockSpec((h_blk, tk, d), lambda hb, qi, ki: (hb, ki, 0)),
                pl.BlockSpec((h_blk, tk, d), lambda hb, qi, ki: (hb, ki, 0)),
            ],
            out_specs=pl.BlockSpec((h_blk, tq, d), lambda hb, qi, ki: (hb, qi, 0)),
            scratch_shapes=[
                pltpu.VMEM((h_blk, tq, d), q.dtype),        # scaled q (hoisted)
                pltpu.VMEM((h_blk, tq, 1), jnp.float32),    # running max m
                pltpu.VMEM((h_blk, tq, 1), jnp.float32),    # running sum l
                pltpu.VMEM((h_blk, tq, d), jnp.float32),    # output accumulator
            ],
        ),
        compiler_params=pltpu.CompilerParams(
            dimension_semantics=("parallel", "parallel", "arbitrary"),
            vmem_limit_bytes=int(vmem_limit),
        ),
        cost_estimate=pl.CostEstimate(
            flops=flops,
            transcendentals=transcendentals,
            bytes_accessed=bytes_accessed,
        ),
    )(qf, kf, vf)

    return out.reshape(b, h, n_q, d)


def attend_reference(q, k, v, scale=None):
    """Pure-JAX reference mirroring the PyTorch einsum path."""
    d = q.shape[-1]
    if scale is None:
        scale = d ** (-0.5)
    sim = jnp.einsum('bhid,bhjd->bhij', q, k) * scale
    attn = jax.nn.softmax(sim, axis=-1)
    return jnp.einsum('bhij,bhjd->bhid', attn, v)


if __name__ == "__main__":
    key = jax.random.PRNGKey(0)
    kq, kk, kv = jax.random.split(key, 3)

    b, h, n, d = 2, 4, 8, 32
    q = jax.random.normal(kq, (b, h, n, d), dtype=jnp.float32)
    k = jax.random.normal(kk, (b, h, n, d), dtype=jnp.float32)
    v = jax.random.normal(kv, (b, h, n, d), dtype=jnp.float32)

    out = attend(q, k, v)
    out = jax.block_until_ready(out)

    ref = attend_reference(q, k, v)
    assert out.shape == (b, h, n, d)
    assert jnp.allclose(out, ref, atol=1e-3, rtol=1e-3), (
        f"max diff {jnp.max(jnp.abs(out - ref))}"
    )
    print("KERNEL_OK")
</pallas_src>

<mosaic_0001>
module attributes {stable_mosaic.version = 11 : i64} {
  func.func @_flash_attend_kernel(%arg0: i32, %arg1: i32, %arg2: i32, %arg3: memref<2x8x32xf32, #tpu.memory_space<vmem>>, %arg4: memref<2x8x32xf32, #tpu.memory_space<vmem>>, %arg5: memref<2x8x32xf32, #tpu.memory_space<vmem>>, %arg6: memref<2x8x32xf32, #tpu.memory_space<vmem>>, %arg7: memref<2x8x32xf32, #tpu.memory_space<vmem>>, %arg8: memref<2x8x1xf32, #tpu.memory_space<vmem>>, %arg9: memref<2x8x1xf32, #tpu.memory_space<vmem>>, %arg10: memref<2x8x32xf32, #tpu.memory_space<vmem>>) attributes {dimension_semantics = [#tpu.dimension_semantics<parallel>, #tpu.dimension_semantics<parallel>, #tpu.dimension_semantics<arbitrary>], iteration_bounds = array<i64: 4, 1, 1>, scalar_prefetch = 0 : i64, scratch_operands = 4 : i64, tpu.core_type = #tpu.core_type<tc>, window_params = [{transform_indices = @transform_0, window_bounds = array<i64: 2, 8, 32>}, {transform_indices = @transform_1, window_bounds = array<i64: 2, 8, 32>}, {transform_indices = @transform_2, window_bounds = array<i64: 2, 8, 32>}, {transform_indices = @transform_3, window_bounds = array<i64: 2, 8, 32>}]} {
    %c0_i32 = arith.constant 0 : i32
    %0 = arith.cmpi eq, %arg2, %c0_i32 : i32
    %1 = arith.extui %0 : i1 to i32
    %c0_i32_0 = arith.constant 0 : i32
    %2 = arith.cmpi ne, %1, %c0_i32_0 : i32
    scf.if %2 {
      %c0_32 = arith.constant 0 : index
      %c0_33 = arith.constant 0 : index
      %c0_34 = arith.constant 0 : index
      %32 = vector.load %arg3[%c0_32, %c0_33, %c0_34] : memref<2x8x32xf32, #tpu.memory_space<vmem>>, vector<2x8x32xf32>
      %cst_35 = arith.constant 0.176776692 : f32
      %33 = vector.broadcast %cst_35 : f32 to vector<2x8x32xf32>
      %34 = arith.mulf %32, %33 : vector<2x8x32xf32>
      %c0_36 = arith.constant 0 : index
      %c0_37 = arith.constant 0 : index
      %c0_38 = arith.constant 0 : index
      %35 = vector.load %arg7[%c0_36, %c0_37, %c0_38] : memref<2x8x32xf32, #tpu.memory_space<vmem>>, vector<2x8x32xf32>
      tpu.vector_store %arg7[%c0_36, %c0_37, %c0_38], %34 {strides = array<i32>} : memref<2x8x32xf32, #tpu.memory_space<vmem>>, vector<2x8x32xf32>,
      %cst_39 = arith.constant 0xFF800000 : f32
      %36 = vector.broadcast %cst_39 : f32 to vector<2x8x1xf32>
      %c0_40 = arith.constant 0 : index
      %c0_41 = arith.constant 0 : index
      %c0_42 = arith.constant 0 : index
      %37 = vector.load %arg8[%c0_40, %c0_41, %c0_42] : memref<2x8x1xf32, #tpu.memory_space<vmem>>, vector<2x8x1xf32>
      tpu.vector_store %arg8[%c0_40, %c0_41, %c0_42], %36 {strides = array<i32>} : memref<2x8x1xf32, #tpu.memory_space<vmem>>, vector<2x8x1xf32>,
      %cst_43 = arith.constant 0.000000e+00 : f32
      %38 = vector.broadcast %cst_43 : f32 to vector<2x8x1xf32>
      %c0_44 = arith.constant 0 : index
      %c0_45 = arith.constant 0 : index
      %c0_46 = arith.constant 0 : index
      %39 = vector.load %arg9[%c0_44, %c0_45, %c0_46] : memref<2x8x1xf32, #tpu.memory_space<vmem>>, vector<2x8x1xf32>
      tpu.vector_store %arg9[%c0_44, %c0_45, %c0_46], %38 {strides = array<i32>} : memref<2x8x1xf32, #tpu.memory_space<vmem>>, vector<2x8x1xf32>,
      %cst_47 = arith.constant 0.000000e+00 : f32
      %40 = vector.broadcast %cst_47 : f32 to vector<2x8x32xf32>
      %c0_48 = arith.constant 0 : index
      %c0_49 = arith.constant 0 : index
      %c0_50 = arith.constant 0 : index
      %41 = vector.load %arg10[%c0_48, %c0_49, %c0_50] : memref<2x8x32xf32, #tpu.memory_space<vmem>>, vector<2x8x32xf32>
      tpu.vector_store %arg10[%c0_48, %c0_49, %c0_50], %40 {strides = array<i32>} : memref<2x8x32xf32, #tpu.memory_space<vmem>>, vector<2x8x32xf32>,
    } else {
    }
    %c0 = arith.constant 0 : index
    %c0_1 = arith.constant 0 : index
    %c0_2 = arith.constant 0 : index
    %3 = vector.load %arg7[%c0, %c0_1, %c0_2] : memref<2x8x32xf32, #tpu.memory_space<vmem>>, vector<2x8x32xf32>
    %c0_3 = arith.constant 0 : index
    %c0_4 = arith.constant 0 : index
    %c0_5 = arith.constant 0 : index
    %4 = vector.load %arg4[%c0_3, %c0_4, %c0_5] : memref<2x8x32xf32, #tpu.memory_space<vmem>>, vector<2x8x32xf32>
    %c0_6 = arith.constant 0 : index
    %c0_7 = arith.constant 0 : index
    %c0_8 = arith.constant 0 : index
    %5 = vector.load %arg5[%c0_6, %c0_7, %c0_8] : memref<2x8x32xf32, #tpu.memory_space<vmem>>, vector<2x8x32xf32>
    %cst = arith.constant dense<0.000000e+00> : vector<2x8x8xf32>
    %6 = tpu.matmul %3, %4, %cst {dimension_numbers = #tpu.dot_dimension_numbers<[2], [2], [1], [1], [0, 0, 0, 1, 1, 1], [0], [0]>} : vector<2x8x32xf32>, vector<2x8x32xf32>, vector<2x8x8xf32> -> vector<2x8x8xf32>
    %c0_9 = arith.constant 0 : index
    %c0_10 = arith.constant 0 : index
    %c0_11 = arith.constant 0 : index
    %7 = vector.load %arg8[%c0_9, %c0_10, %c0_11] : memref<2x8x1xf32, #tpu.memory_space<vmem>>, vector<2x8x1xf32>
    %cst_12 = arith.constant dense<0xFF800000> : vector<2x8xf32>
    %8 = vector.multi_reduction <maximumf>, %6, %cst_12 [2] : vector<2x8x8xf32> to vector<2x8xf32>
    %9 = vector.shape_cast %8 : vector<2x8xf32> to vector<2x8x1xf32>
    %10 = arith.maximumf %7, %9 : vector<2x8x1xf32>
    %11 = arith.subf %7, %10 : vector<2x8x1xf32>
    %12 = math.exp %11 : vector<2x8x1xf32>
    %13 = vector.broadcast %10 : vector<2x8x1xf32> to vector<2x8x8xf32>
    %14 = arith.subf %6, %13 : vector<2x8x8xf32>
    %15 = math.exp %14 : vector<2x8x8xf32>
    %c0_13 = arith.constant 0 : index
    %c0_14 = arith.constant 0 : index
    %c0_15 = arith.constant 0 : index
    %16 = vector.load %arg9[%c0_13, %c0_14, %c0_15] : memref<2x8x1xf32, #tpu.memory_space<vmem>>, vector<2x8x1xf32>
    %17 = arith.mulf %12, %16 : vector<2x8x1xf32>
    %cst_16 = arith.constant dense<0.000000e+00> : vector<2x8xf32>
    %18 = vector.multi_reduction <add>, %15, %cst_16 [2] : vector<2x8x8xf32> to vector<2x8xf32>
    %19 = vector.shape_cast %18 : vector<2x8xf32> to vector<2x8x1xf32>
    %20 = arith.addf %17, %19 : vector<2x8x1xf32>
    %c0_17 = arith.constant 0 : index
    %c0_18 = arith.constant 0 : index
    %c0_19 = arith.constant 0 : index
    %21 = vector.load %arg9[%c0_17, %c0_18, %c0_19] : memref<2x8x1xf32, #tpu.memory_space<vmem>>, vector<2x8x1xf32>
    tpu.vector_store %arg9[%c0_17, %c0_18, %c0_19], %20 {strides = array<i32>} : memref<2x8x1xf32, #tpu.memory_space<vmem>>, vector<2x8x1xf32>,
    %cst_20 = arith.constant dense<0.000000e+00> : vector<2x8x32xf32>
    %22 = tpu.matmul %15, %5, %cst_20 {dimension_numbers = #tpu.dot_dimension_numbers<[2], [1], [1], [2], [0, 0, 0, 1, 1, 2], [0], [0]>} : vector<2x8x8xf32>, vector<2x8x32xf32>, vector<2x8x32xf32> -> vector<2x8x32xf32>
    %c0_21 = arith.constant 0 : index
    %c0_22 = arith.constant 0 : index
    %c0_23 = arith.constant 0 : index
    %23 = vector.load %arg10[%c0_21, %c0_22, %c0_23] : memref<2x8x32xf32, #tpu.memory_space<vmem>>, vector<2x8x32xf32>
    %24 = vector.broadcast %12 : vector<2x8x1xf32> to vector<2x8x32xf32>
    %25 = arith.mulf %24, %23 : vector<2x8x32xf32>
    %26 = arith.addf %25, %22 : vector<2x8x32xf32>
    %c0_24 = arith.constant 0 : index
    %c0_25 = arith.constant 0 : index
    %c0_26 = arith.constant 0 : index
    %27 = vector.load %arg10[%c0_24, %c0_25, %c0_26] : memref<2x8x32xf32, #tpu.memory_space<vmem>>, vector<2x8x32xf32>
    tpu.vector_store %arg10[%c0_24, %c0_25, %c0_26], %26 {strides = array<i32>} : memref<2x8x32xf32, #tpu.memory_space<vmem>>, vector<2x8x32xf32>,
    %c0_27 = arith.constant 0 : index
    %c0_28 = arith.constant 0 : index
    %c0_29 = arith.constant 0 : index
    %28 = vector.load %arg8[%c0_27, %c0_28, %c0_29] : memref<2x8x1xf32, #tpu.memory_space<vmem>>, vector<2x8x1xf32>
    tpu.vector_store %arg8[%c0_27, %c0_28, %c0_29], %10 {strides = array<i32>} : memref<2x8x1xf32, #tpu.memory_space<vmem>>, vector<2x8x1xf32>,
    %c0_i32_30 = arith.constant 0 : i32
    %29 = arith.cmpi eq, %arg2, %c0_i32_30 : i32
    %30 = arith.extui %29 : i1 to i32
    %c0_i32_31 = arith.constant 0 : i32
    %31 = arith.cmpi ne, %30, %c0_i32_31 : i32
    scf.if %31 {
      %c0_32 = arith.constant 0 : index
      %c0_33 = arith.constant 0 : index
      %c0_34 = arith.constant 0 : index
      %32 = vector.load %arg9[%c0_32, %c0_33, %c0_34] : memref<2x8x1xf32, #tpu.memory_space<vmem>>, vector<2x8x1xf32>
      %33 = tpu.reciprocal %32 : vector<2x8x1xf32> -> vector<2x8x1xf32>
      %c0_35 = arith.constant 0 : index
      %c0_36 = arith.constant 0 : index
      %c0_37 = arith.constant 0 : index
      %34 = vector.load %arg10[%c0_35, %c0_36, %c0_37] : memref<2x8x32xf32, #tpu.memory_space<vmem>>, vector<2x8x32xf32>
      %35 = vector.broadcast %33 : vector<2x8x1xf32> to vector<2x8x32xf32>
      %36 = arith.mulf %34, %35 : vector<2x8x32xf32>
      %c0_38 = arith.constant 0 : index
      %c0_39 = arith.constant 0 : index
      %c0_40 = arith.constant 0 : index
      %37 = vector.load %arg6[%c0_38, %c0_39, %c0_40] : memref<2x8x32xf32, #tpu.memory_space<vmem>>, vector<2x8x32xf32>
      tpu.vector_store %arg6[%c0_38, %c0_39, %c0_40], %36 {strides = array<i32>} : memref<2x8x32xf32, #tpu.memory_space<vmem>>, vector<2x8x32xf32>,
    } else {
    }
    return
  }
  func.func @transform_0(%arg0: i32, %arg1: i32, %arg2: i32) -> (i32, i32, i32) {
    %c0_i32 = arith.constant 0 : i32
    %c0_i32_0 = arith.constant 0 : i32
    return %arg0, %arg1, %c0_i32 : i32, i32, i32
  }
  func.func @transform_1(%arg0: i32, %arg1: i32, %arg2: i32) -> (i32, i32, i32) {
    %c0_i32 = arith.constant 0 : i32
    %c0_i32_0 = arith.constant 0 : i32
    return %arg0, %arg2, %c0_i32 : i32, i32, i32
  }
  func.func @transform_2(%arg0: i32, %arg1: i32, %arg2: i32) -> (i32, i32, i32) {
    %c0_i32 = arith.constant 0 : i32
    %c0_i32_0 = arith.constant 0 : i32
    return %arg0, %arg2, %c0_i32 : i32, i32, i32
  }
  func.func @transform_3(%arg0: i32, %arg1: i32, %arg2: i32) -> (i32, i32, i32) {
    %c0_i32 = arith.constant 0 : i32
    %c0_i32_0 = arith.constant 0 : i32
    return %arg0, %arg1, %c0_i32 : i32, i32, i32
  }
}

</mosaic_0001>

<bundles_post_ra>
// kernel: tpu_custom_call.1
= control target key start
LH: loop header
LB: loop body
LE: loop exit
PB: predicated region body
PF: predicated region fallthrough
CT: control target
= control target key end

     0   :  { %s1470_s0 = inlined_call_operand.hbm [shape: f32[8,8,32], index: 0, kind: input, shape index: {}]   ;;  %s1471_s1 = inlined_call_operand.hbm [shape: f32[8,8,32], index: 1, kind: input, shape index: {}]   ;;  %s1472_s2 = inlined_call_operand.hbm [shape: f32[8,8,32], index: 2, kind: input, shape index: {}]   ;;  %s1473_s3 = inlined_call_operand.hbm [shape: f32[8,8,32], index: 3, kind: output, shape index: {}]  }
   0x1   :  { %1479 = sst [smem:[#allocation19_spill]] %s1471_s1 }
   0x2   :  { %8 = vsyncpa [#allocation7], 0 }
   0x3   :  { %10 = vsyncpa [#allocation7 + $0x1], 0 }
   0x4   :  { %11 = vsyncpa [#allocation10], 0 }
   0x5   :  { %13 = vsyncpa [#allocation10 + $0x1], 0 }
   0x6   :  { %14 = vsyncpa [#allocation8], 0 }
   0x7   :  { %16 = vsyncpa [#allocation8 + $0x1], 0  ;;  %s1221_s12 = smov 0   ;;  %s1223_s13 = smov 0  }
   0x8   :  { %s1225_s14 = smov 0   ;;  %s1227_s15 = smov 0  }
   0x9   :  { %s1229_s16 = smov 0   ;;  %s1231_s17 = smov 0  }
   0xa LB: > { %1480 = sst [smem:[#allocation16_spill]] %s1183_s16  ;;  %s1252_s18 = sadd.s32 4294967295, %s1187_s17   ;;  %s1187_s17 = sphi %s1231_s17, %s22_s17   ;;  %s1183_s16 = sphi %s1229_s16, %s1494_s16   ;;  %s1179_s15 = sphi %s1227_s15, %s1493_s15   ;;  %s1175_s14 = sphi %s1225_s14, %s1497_s14   ;;  %s1171_s13 = sphi %s1223_s13, %s1496_s13   ;;  %s1167_s12 = sphi %s1221_s12, %s1495_s12  }
   0xb   : > { %s865_s19 = sadd.s32 4294967294, %s1187_s17   ;;  %s41_s20 = sadd.s32 1, %s1183_s16 }
   0xc   : > { %s50_s21 = sadd.s32 1, %s1175_s14  ;;  %p43_p0 = scmp.ge.s32.totalorder %s41_s20, 4 }
   0xd   : > { %p57_p1 = scmp.ne.s32.totalorder %s1175_s14, %s1171_s13  ;;  %p58_p2 = scmp.eq.s32.totalorder %s1187_s17, 0 }
   0xe   : > { %p63_p3 = scmp.ne.s32.totalorder %s1171_s13, %s1167_s12  ;;  %s1499_s20 = smov (%p43_p0, %s41_s20), 0 }
   0xf   : > { %1481 = sst [smem:[#allocation17_spill]] %s1499_s20  ;;  %p1264_p4 = por %p58_p2, %p57_p1 }
  0x10   : > { %p64_p5 = scmp.eq.s32.totalorder %s1252_s18, 0  ;;  %s45_s23 = ssub.s32 %s1183_s16, %s1499_s20 }
  0x11   : > { %p145_p6 = scmp.eq.s32.totalorder %s1252_s18, 3  ;;  %p48_p7 = scmp.eq.s32.totalorder %s45_s23, 0 }
  0x12   : > { %p1272_p8 = por %p64_p5, %p63_p3  ;;  %p151_p10 = scmp.eq.s32.totalorder %s865_s19, 3 }
  0x13   : > { %p1276_p9 = por %p145_p6, %p57_p1  ;;  %p947_p12 = scmp.lt.s32.totalorder %s1187_s17, 4 }
  0x14   : > { %s1281_s26 = scalar_select %p48_p7, %s1175_s14, %s50_s21  }
  0x15   : > { %p1283_p11 = por %p151_p10, %p63_p3  ;;  %s1474_s28 = sand.u32 1, %s1175_s14  }
  0x16   : > { %1485 = sst [smem:[#allocation18_spill]] %s1281_s26  ;;  %s1291_s29 = sshll.u32 %s1474_s28, 4 }
  0x17   : > { %s1294_s30 = sshll.u32 %s1183_s16, 8  ;;  %p1298_p13 = pnand %p947_p12, %p1264_p4 }
  0x18   : > { %s193_s5 = sand.u32 1, %s1187_s17   ;;  %s1488_s1 = sld [smem:[#allocation19_spill]] }
  0x19   : > { %s197_s9 = scalar_lea.vmem [#allocation9], %s1291_s29  ;;  %p877_p0 = scmp.ge.s32.totalorder %s1187_s17, 1 }
  0x1a   : > { %s205_s10 = sshll.u32 %s197_s9, 4  ;;  %p235_p1 = scmp.lt.s32.totalorder %s1187_s17, 5  ;;  %s206_s10 = int_to_ptr.vmem [resolvable:$true] %s205_s10 }
  0x1b   : > { %s1310_s11 = scalar_lea.sflag [#allocation10], %s193_s5  ;;  %p1021_p2 = pneg %p1298_p13 }
  0x1c   : > { %s1032_s19 = scalar_lea.vmem %s206_s10, 256  ;;  %s1189_s21 = smov [#allocation9]  }
  0x1d   : > { %p1033_p3 = scmp.ne.s32.totalorder %s206_s10, %s1032_s19  ;;  %s1037_s22 = sshll.u32 %s1189_s21, 4  ;;  %s1038_s22 = int_to_ptr.vmem [resolvable:$false] %s1037_s22 }
  0x1e   : > { %s204_s8 = scalar_lea.hbm %s1488_s1, %s1294_s30  ;;  %s1039_s23 = scalar_lea.vmem %s1038_s22, 512 }
  0x1f   : > { %p1035_p4 = pnand %p1033_p3, %p1021_p2  ;;  %p1040_p6 = scmp.lt.s32.totalorder %s206_s10, %s1038_s22 }
  0x20   : > { %p1041_p7 = scmp.lt.s32.totalorder %s1039_s23, %s1032_s19 }
  0x21   : > { %p1036_p5 = pneg %p1035_p4 }
  0x22   : > { %p1042_p10 = por %p1041_p7, %p1040_p6 }
  0x24   : > { %p1043_p12 = pnand %p1042_p10, %p1036_p5 }
  0x26   : > { %1046 = shalt.err (!%p1043_p12)
}
  0x27   : > { %s1477_s6 = smov 128   ;;  %s1191_s5 = smov 8  }
  0x28   : > { %939 = dma.hbm_to_vmem [thread:$0]  (!%p1298_p13), %s204_s8, 256, %s206_s10, %s1310_s11, %s1477_s6, %s1477_s6, %s1191_s5  }
  0x29   : > { %p1327_p3 = pnand %p877_p0, %p235_p1  ;;  %s182_s21 = scalar_lea.hbm %s1470_s0, %s1294_s30 }
  0x2a   : > { %s175_s22 = scalar_lea.vmem [#allocation6], %s1291_s29  ;;  %s226_s20 = scalar_lea.hbm %s1472_s2, %s1294_s30 }
  0x2b   : > { %s183_s23 = sshll.u32 %s175_s22, 4  ;;  %s1490_s16 = sand.u32 1, %s1175_s14   ;;  %s184_s23 = int_to_ptr.vmem [resolvable:$true] %s183_s23 }
  0x2c   : > { %s172_s26 = scalar_lea.sflag [#allocation7], %s1490_s16  ;;  %s1060_s8 = scalar_lea.vmem %s184_s23, 256 }
  0x2d   : > { %p1061_p4 = scmp.ne.s32.totalorder %s184_s23, %s1060_s8  ;;  %s1192_s10 = smov [#allocation6]  }
  0x2e   : > { %s1065_s6 = sshll.u32 %s1192_s10, 4  ;;  %s1066_s6 = int_to_ptr.vmem [resolvable:$false] %s1065_s6 }
  0x2f   : > { %p1063_p0 = pnand %p1061_p4, %p1021_p2  ;;  %s1067_s9 = scalar_lea.vmem %s1066_s6, 512 }
  0x30   : > { %p1068_p5 = scmp.lt.s32.totalorder %s184_s23, %s1066_s6  ;;  %p1069_p6 = scmp.lt.s32.totalorder %s1067_s9, %s1060_s8 }
  0x31   : > { %p1064_p1 = pneg %p1063_p0 }
  0x32   : > { %p1070_p7 = por %p1069_p6, %p1068_p5 }
  0x34   : > { %p1071_p10 = pnand %p1070_p7, %p1064_p1 }
  0x36   : > { %1074 = shalt.err (!%p1071_p10)
}
  0x37   : > { %s1491_s1 = smov 128   ;;  %s219_s16 = scalar_lea.vmem [#allocation11], %s1291_s29 }
  0x38   : > { %936 = dma.hbm_to_vmem [thread:$0]  (!%p1298_p13), %s182_s21, 256, %s184_s23, %s172_s26, %s1491_s1, %s1491_s1, %s1191_s5  }
  0x39   : > { %s227_s28 = sshll.u32 %s219_s16, 4  ;;  %s1193_s6 = smov [#allocation11]   ;;  %s228_s28 = int_to_ptr.vmem [resolvable:$true] %s227_s28 }
  0x3a   : > { %s1088_s19 = scalar_lea.vmem %s228_s28, 256  ;;  %s1093_s22 = sshll.u32 %s1193_s6, 4  ;;  %s1094_s22 = int_to_ptr.vmem [resolvable:$false] %s1093_s22 }
  0x3b   : > { %p1089_p12 = scmp.ne.s32.totalorder %s228_s28, %s1088_s19  ;;  %s1095_s8 = scalar_lea.vmem %s1094_s22, 512 }
  0x3c   : > { %p1096_p1 = scmp.lt.s32.totalorder %s228_s28, %s1094_s22  ;;  %p1097_p5 = scmp.lt.s32.totalorder %s1095_s8, %s1088_s19 }
  0x3d   : > { %p1091_p4 = pnand %p1089_p12, %p1021_p2 }
  0x3e   : > { %p1098_p6 = por %p1097_p5, %p1096_p1 }
  0x3f   : > { %p1092_p0 = pneg %p1091_p4 }
  0x41   : > { %p1099_p7 = pnand %p1098_p6, %p1092_p0 }
  0x43   : > { %1102 = shalt.err (!%p1099_p7)
}
  0x44   : > { %942 = dma.hbm_to_vmem [thread:$0]  (!%p1298_p13), %s226_s20, 256, %s228_s28, %s1310_s11, %s1491_s1, %s1491_s1, %s1191_s5  }
  0x45   : > { %239 = sbr.rel (%p1327_p3) target bundleno = 873 (0x369), region = 32  ;;  %s1368_s21 = sand.u32 (!%p1327_p3), 1, %s1171_s13  }
  0x46   : > { %s1371_s4 = sshll.u32 (!%p1327_p3), %s1368_s21, 4  ;;  %s242_s23 = scalar_lea.sflag (!%p1327_p3), [#allocation7], %s1368_s21 }
  0x47   : > { %s245_s10 = scalar_lea.vmem (!%p1327_p3), [#allocation6], %s1371_s4 }
  0x4a   : > { %1154 = dma.done.wait (%p1272_p8), %s242_s23, 256  }
  0x4b   : > { %1156 = vsyncadd (%p1272_p8), %s242_s23, 4294967040  ;;  %s250_s20 = sand.u32 1, %s1252_s18   ;;  %s254_s11 = scalar_lea.vmem [#allocation9], %s1371_s4 }
  0x4c   : > { %s251_s30 = scalar_lea.sflag [#allocation10], %s250_s20 }
  0x4d   : > { %1158 = dma.done.wait (%p1272_p8), %s251_s30, 512  }
  0x4e   : > { %1160 = vsyncadd (%p1272_p8), %s251_s30, 4294966784  ;;  %vm308_vm0 = vcmask 261120   ;;  %v1194_v0 = vmov 0.0   ;;  %vm1195_vm1 = vmmov 0   ;;  %v320_v1 = vld [vmem:[%s254_s11] sm:$0xff]  ;;  %v321_v2 = vld [vmem:[%s254_s11 + $0x8] sm:$0xff] }
  0x4f   : > { %905 = vmatprep.subr.mxu0 %v1194_v0  ;;  %316 = vst.msk [vmem:[#allocation5] sm:$0xff] %vm308_vm0, %v1194_v0  ;;  %317 = vst.msk [vmem:[#allocation5 + $0x8] sm:$0xff] %vm308_vm0, %v1194_v0  ;;  %910 = vmatprep.subr.mxu1 %v1194_v0  ;;  %v304_v3 = vld [vmem:[%s245_s10] sm:$0xff]  ;;  %v305_v5 = vld [vmem:[%s245_s10 + $0x8] sm:$0xff]  ;;  %vm311_vm2 = vcmask 7168   ;;  %v1196_v9 = vmov -inf  }
  0x50   : > { %907 = vmatprep.mubr.msk.f32.mxu0 %vm1195_vm1, %v1194_v0  ;;  %912 = vmatprep.mubr.msk.f32.mxu1 %vm1195_vm1, %v1194_v0  ;;  %v306_v4 = vmul.f32 0.17677669, %v304_v3  ;;  %v307_v6 = vmul.f32 0.17677669, %v305_v5  ;;  %312 = vst.msk [vmem:[#allocation3] sm:$0xff] %vm311_vm2, %v1196_v9  ;;  %313 = vst.msk [vmem:[#allocation3 + $0x8] sm:$0xff] %vm311_vm2, %v1196_v9 }
  0x51   : > { %906 = vmatpush3.xpose.msk.msra.mxu0 %vm308_vm0, %v320_v1  ;;  %911 = vmatpush3.xpose.msk.msra.mxu1 %vm308_vm0, %v321_v2  ;;  %314 = vst.msk [vmem:[#allocation4] sm:$0xff] %vm311_vm2, %v1194_v0  ;;  %315 = vst.msk [vmem:[#allocation4 + $0x8] sm:$0xff] %vm311_vm2, %v1194_v0  ;;  %vm479_vm3 = vcmask 64512   ;;  %v1197_v16 = vmov 0   ;;  %s263_s18 = scalar_lea.vmem [#allocation11], %s1371_s4  ;;  %s295_s24 = scalar_lea.vmem [#allocation12], %s1371_s4 }
  0x52   : > { %915 = vmatprep.subr.mxu0 %v1194_v0  ;;  %920 = vmatprep.subr.mxu1 %v1194_v0  ;;  %309 = vst.msk [vmem:[#allocation2] sm:$0xff] %vm308_vm0, %v306_v4  ;;  %310 = vst.msk [vmem:[#allocation2 + $0x8] sm:$0xff] %vm308_vm0, %v307_v6  ;;  %v322_v25 = vld [vmem:[%s263_s18] sm:$0xff]  ;;  %v323_v26 = vld [vmem:[%s263_s18 + $0x8] sm:$0xff]  ;;  %s729_s5 = sshll.u32 %s295_s24, 4  ;;  %s896_s7 = sshll.u32 %s1179_s15, 8  ;;  %s1416_s5 = int_to_ptr.vmem [resolvable:$true] %s729_s5 }
  0x53   : > { %1005 = vset.pattern.permute.xlu1 %v1197_v16  ;;  %1006 = vset.pattern.permute.xlu0 %v1197_v16  ;;  %s1422_s16 = scalar_lea.hbm %s1473_s3, %s896_s7  ;;  %s715_s28 = scalar_lea.sflag [#allocation8], %s1368_s21 }
  0x54   : > { %s1103_s19 = scalar_lea.vmem %s1416_s5, 256  ;;  %s1198_s15 = smov [#allocation12]  }
  0x55   : > { %p1104_p8 = scmp.ne.s32.totalorder %s1416_s5, %s1103_s19  ;;  %s1107_s6 = sshll.u32 %s1198_s15, 4  ;;  %s1108_s6 = int_to_ptr.vmem [resolvable:$false] %s1107_s6 }
  0x56   : > { %v671_v53 = vld [vmem:[#allocation5] sm:$0xff]  ;;  %v672_v56 = vld [vmem:[#allocation5 + $0x8] sm:$0xff]  ;;  %s1109_s22 = scalar_lea.vmem %s1108_s6, 512  ;;  %p1110_p3 = scmp.lt.s32.totalorder %s1416_s5, %s1108_s6 }
  0x57   : > { %v477_v17 = vld [vmem:[#allocation3] sm:$0xff]  ;;  %v478_v20 = vld [vmem:[#allocation3 + $0x8] sm:$0xff]  ;;  %p1105_p13 = pnand %p1104_p8, %p1276_p9  ;;  %p1111_p10 = scmp.lt.s32.totalorder %s1109_s22, %s1103_s19 }
  0x58   : > { %v510_v41 = vld [vmem:[#allocation4] sm:$0xff]  ;;  %v511_v44 = vld [vmem:[#allocation4 + $0x8] sm:$0xff] }
  0x59   : > { %v318_v7 = vld [vmem:[#allocation2] sm:$0xff]  ;;  %v319_v8 = vld [vmem:[#allocation2 + $0x8] sm:$0xff]  ;;  %p1106_p2 = pneg %p1105_p13  ;;  %p1112_p12 = por %p1111_p10, %p1110_p3 }
  0x5a   : > { %908 = vmatmul.mubr.msk.f32.vlgmr.msra.gmra.mxu0 %vm308_vm0, %v318_v7  ;;  %913 = vmatmul.mubr.msk.f32.vlgmr.msra.gmra.mxu1 %vm308_vm0, %v319_v8 }
  0x5b   : > { %917 = vmatprep.mubr.msk.f32.mxu0 %vm1195_vm1, %v1194_v0  ;;  %922 = vmatprep.mubr.msk.f32.mxu1 %vm1195_vm1, %v1194_v0  ;;  %p1113_p4 = pnand %p1112_p12, %p1106_p2 }
  0x5c   : > { %916 = vmatpush3.msra.mxu0 %v322_v25  ;;  %921 = vmatpush3.msra.mxu1 %v323_v26 }
 0x11a   : > { %v397_v10 = vpop.f32.mrf.mxu0  ;;  %v473_v11 = vpop.f32.mrf.mxu1 }
 0x11b   : > { %v480_v12 = vsel %vm479_vm3, %v397_v10, -inf  ;;  %v483_v15 = vsel %vm479_vm3, %v473_v11, -inf }
 0x11c   : > { %481 = vmax.xlane.f32.xlu0 %v480_v12  ;;  %v909_v13 = vpop.f32.mrf.mxu0  ;;  %v914_v14 = vpop.f32.mrf.mxu1 }
 0x120   : > { %484 = vmax.xlane.f32.xlu0 %v483_v15 }
 0x1a5   : > { %v482_v18 = vpop.xlane.xlu0 %481 }
 0x1a6   : > { %v486_v19 = vmax.f32 %v477_v17, %v482_v18 }
 0x1a8   : > { %v488_v21 = vsub.f32 %v477_v17, %v486_v19  ;;  %689 = vst.msk [vmem:[#allocation3] sm:$0xff] %vm311_vm2, %v486_v19  ;;  %496 = vperm.xlu1 %1005, %v486_v19  }
 0x1a9   : > { %v485_v22 = vpop.xlane.xlu0 %484 }
 0x1aa   : > { %v487_v23 = vmax.f32 %v478_v20, %v485_v22  ;;  %v490_v38 = vmul.f32 1.442695, %v488_v21 }
 0x1ac   : > { %v489_v24 = vsub.f32 %v478_v20, %v487_v23  ;;  %690 = vst.msk [vmem:[#allocation3 + $0x8] sm:$0xff] %vm311_vm2, %v487_v23  ;;  %501 = vperm.xlu1 %1005, %v487_v23  }
 0x1ae   : > { %v492_v36 = vmul.f32 1.442695, %v489_v24 }
 0x223   : > { %v497_v27 = vpop.permute.xlu1 %496 }
 0x224   : > { %v504_v28 = vsub.f32 %v397_v10, %v497_v27 }
 0x226   : > { %v506_v29 = vmul.f32 1.442695, %v504_v28 }
 0x227   : > { %v502_v30 = vpop.permute.xlu1 %501 }
 0x228   : > { %1007 = vpow2.f32 %v506_v29  ;;  %v505_v31 = vsub.f32 %v473_v11, %v502_v30 }
 0x22a   : > { %v508_v32 = vmul.f32 1.442695, %v505_v31 }
 0x22c   : > { %1009 = vpow2.f32 %v508_v32 }
 0x22d   : > { %1011 = vpow2.f32 %v492_v36 }
 0x22e   : > { %1013 = vpow2.f32 %v490_v38 }
 0x235   : > { %v1008_v33 = vpop.eup %1007 }
 0x236   : > { %918 = vmatmul.mubr.msk.f32.vlgmr.msra.gmra.mxu0 %vm479_vm3, %v1008_v33  ;;  %v514_v34 = vsel %vm479_vm3, %v1008_v33, 0.0 }
 0x237   : > { %515 = vadd.xlane.f32.xlu0 %v514_v34 }
 0x239   : > { %v1010_v35 = vpop.eup %1009 }
 0x23a   : > { %923 = vmatmul.mubr.msk.f32.vlgmr.msra.gmra.mxu1 %vm479_vm3, %v1010_v35  ;;  %v517_v37 = vsel %vm479_vm3, %v1010_v35, 0.0  ;;  %v1012_v39 = vpop.eup %1011 }
 0x23b   : > { %518 = vadd.xlane.f32.xlu1 %v517_v37  ;;  %v1014_v40 = vpop.eup %1013  ;;  %v513_v46 = vmul.f32 %v1012_v39, %v511_v44 }
 0x23c   : > { %v512_v42 = vmul.f32 %v1014_v40, %v510_v41 }
 0x24c   : > { %680 = vperm.xlu1 %1005, %v1012_v39  }
 0x24d   : > { %675 = vperm.xlu0 %1006, %v1014_v40  }
 0x2c0   : > { %v516_v43 = vpop.xlane.xlu0 %515 }
 0x2c1   : > { %v520_v45 = vadd.f32 %v516_v43, %v512_v42 }
 0x2c3   : > { %523 = vst.msk [vmem:[#allocation4] sm:$0xff] %vm311_vm2, %v520_v45 }
 0x2c4   : > { %v519_v47 = vpop.xlane.xlu1 %518 }
 0x2c5   : > { %v521_v48 = vadd.f32 %v519_v47, %v513_v46 }
 0x2c7   : > { %524 = vst.msk [vmem:[#allocation4 + $0x8] sm:$0xff] %vm311_vm2, %v521_v48 }
 0x2c8   : > { %v676_v54 = vpop.permute.xlu0 %675  ;;  %v681_v57 = vpop.permute.xlu1 %680 }
 0x2c9   : > { %v683_v55 = vmul.f32 %v676_v54, %v671_v53  ;;  %v684_v61 = vmul.f32 %v681_v57, %v672_v56 }
 0x2ca   : > { %v694_v49 = vld [vmem:[#allocation4] sm:$0xff] }
 0x2cb   : > { %1015 = vrcp.f32 %v694_v49 }
 0x2ce   : > { %v695_v50 = vld [vmem:[#allocation4 + $0x8] sm:$0xff] }
 0x2cf   : > { %1017 = vrcp.f32 %v695_v50 }
 0x2d8   : > { %v1016_v51 = vpop.eup %1015 }
 0x2d9   : > { %702 = vperm.xlu0 %1006, %v1016_v51  }
 0x2dc   : > { %v1018_v52 = vpop.eup %1017 }
 0x2dd   : > { %707 = vperm.xlu0 %1006, %v1018_v52  }
 0x2f6   : > { %v594_v58 = vpop.f32.mrf.mxu0 }
 0x2f7   : > { %v685_v59 = vadd.f32 %v683_v55, %v594_v58 }
 0x2f8   : > { %v919_v60 = vpop.f32.mrf.mxu0 }
 0x2f9   : > { %687 = vst.msk [vmem:[#allocation5] sm:$0xff] %vm308_vm0, %v685_v59 }
 0x2fa   : > { %v667_v62 = vpop.f32.mrf.mxu1 }
 0x2fb   : > { %v686_v63 = vadd.f32 %v684_v61, %v667_v62 }
 0x2fc   : > { %v924_v0 = vpop.f32.mrf.mxu1 }
 0x2fd   : > { %688 = vst.msk [vmem:[#allocation5 + $0x8] sm:$0xff] %vm308_vm0, %v686_v63 }
 0x300   : > { %v698_v2 = vld [vmem:[#allocation5] sm:$0xff] }
 0x304   : > { %v699_v4 = vld [vmem:[#allocation5 + $0x8] sm:$0xff] }
 0x354   : > { %v703_v1 = vpop.permute.xlu0 %702 }
 0x355   : > { %v710_v3 = vmul.f32 %v703_v1, %v698_v2 }
 0x357   : > { %712 = vst.msk [vmem:[%s295_s24] sm:$0xff] %vm308_vm0, %v710_v3 }
 0x358   : > { %v708_v5 = vpop.permute.xlu0 %707 }
 0x359   : > { %v711_v6 = vmul.f32 %v708_v5, %v699_v4 }
 0x35b   : > { %713 = vst.msk [vmem:[%s295_s24 + $0x8] sm:$0xff] %vm308_vm0, %v711_v6 }
 0x35c   : > { %1116 = shalt.err (!%p1113_p4)
}
 0x35d   : > { %s1117_s8 = scalar_lea.hbm %s1422_s16, 256  ;;  %s1121_s4 = scalar_lea.hbm %s1473_s3, 1024 }
 0x35e   : > { %p1118_p0 = scmp.ne.s32.totalorder %s1422_s16, %s1117_s8  ;;  %p1122_p6 = scmp.lt.s32.totalorder %s1422_s16, %s1473_s3 }
 0x35f   : > { %p1123_p7 = scmp.lt.s32.totalorder %s1121_s4, %s1117_s8 }
 0x360   : > { %p1119_p1 = pnand %p1118_p0, %p1276_p9 }
 0x361   : > { %p1124_p8 = por %p1123_p7, %p1122_p6 }
 0x362   : > { %p1120_p5 = pneg %p1119_p1 }
 0x364   : > { %p1125_p13 = pnand %p1124_p8, %p1120_p5 }
 0x366   : > { %1128 = shalt.err (!%p1125_p13)
}
 0x367   : > { %s1199_s20 = smov 128   ;;  %s1200_s30 = smov 8  }
 0x368   : > { %931 = dma.vmem_to_hbm [thread:$0]  (%p1276_p9), %s1416_s5, 256, %s1422_s16, %s715_s28, %s1199_s20, %s1199_s20, %s1200_s30  }
 0x369 PF: > { %p948_p2 = scmp.ge.s32.totalorder %s1187_s17, 2  ;;  %s744_s11 = sand.u32 1, %s1167_s12  }
 0x36a   : > { %s745_s18 = scalar_lea.sflag [#allocation8], %s744_s11 }
 0x36b   : > { %p944_p3 = pnand %p948_p2, %p1283_p11 }
 0x36d   : > { %p945_p10 = pneg %p944_p3 }
 0x36f   : > { %1162 = dma.done.wait (%p945_p10), %s745_s18, 256  }
 0x370   : > { %1164 = vsyncadd (%p945_p10), %s745_s18, 4294967040  ;;  %s22_s17 = sadd.s32 1, %s1187_s17   ;;  %s1492_s25 = sld [smem:[#allocation18_spill]] }
 0x371   : > { %p19_p12 = scmp.ge.s32.totalorder %s22_s17, 6   ;;  %s1493_s15 = sld [smem:[#allocation16_spill]] }
 0x372   : > { %s1494_s16 = sld [smem:[#allocation17_spill]]  ;;  %s1495_s12 = smov %s1171_s13 }
 0x373   : > { %s1496_s13 = smov %s1175_s14  ;;  %21 = sbr.rel (!%p19_p12) target bundleno = 10 (0xa), region = 109 }
 0x376   : > { %s1497_s14 = smov %s1492_s25 }
 0x378   :  { %750 = vsyncpa [#allocation7], 1 }
 0x379   :  { %752 = vsyncpa [#allocation7 + $0x1], 1 }
 0x37a   :  { %753 = vsyncpa [#allocation10], 1 }
 0x37b   :  { %755 = vsyncpa [#allocation10 + $0x1], 1 }
 0x37c   :  { %756 = vsyncpa [#allocation8], 1 }
 0x37d   :  { %758 = vsyncpa [#allocation8 + $0x1], 1 }

</bundles_post_ra>
